<compile_context>
chip_gen: v6e
topology: v6e:2x2x1
jax: 0.10.0
libtpu: 0.0.40
codegen_flags: <defaults>
</compile_context>

<pallas_src>
import functools

import jax
import jax.numpy as jnp
import numpy as np
from jax import lax
from jax.experimental import pallas as pl
from jax.experimental.pallas import tpu as pltpu

# ---- problem dimensions (STATE_DIM / ACTION_DIM / STRATEGY_DIM of the module) ----
STATE_DIM = 16
ACTION_DIM = 4
STRATEGY_DIM = 8
EMBED_DIM = 6          # UnconditionalAnalyzer.embedding_dim
MLP_HIDDEN = 25
SEQ_LEN = 8

SEARCH_MODE = "search"
BACKPROP_MODE = "backprop"

H = STRATEGY_DIM
LW = 4 * H                 # slab lane width == gate width (32)
AN_OUT = 2 * EMBED_DIM     # fused analyzer output width (12)
ACTION_PAD = 8             # actions padded to 8 lanes so the MLP action matmul uses K=8

# slab row offsets (each block padded to a multiple of 8 sublanes, zero-filled)
_R_WAN = 0       # (16, LW)  fused analyzer weight          cols 0:12
_R_BAN = 16      # row 16    fused analyzer bias            cols 0:12
_R_W1E = 24      # (32, LW)  MLP-1 weight, embedding part   rows 0:12, cols 0:25
_R_W1A = 56      # (8,  LW)  MLP-1 weight, action part      rows 0:4,  cols 0:25
_R_B1 = 64       # row 64    MLP-1 bias (+ 1.0 marker at col 25)
_R_WG = 72       # (32, LW)  fused gate weight: gates x hid-features (bias rides feature 25)
_R_WHH_T = 104   # (32, LW)  w_hh transposed: gates x H     cols 0:8
SLAB_ROWS = 136


def _strategy_distiller_kernel(states_ref, actions_ref, hc0_ref, slab_ref, out_ref,
                               *, seq_out):
    f32 = jnp.float32
    T = states_ref.shape[0]

    states = states_ref[...]                                    # (T, 16)
    actions = actions_ref[...]                                  # (T, 8) zero-padded

    # --- unpack the packed parameter slab with static views (zero-padding is inert) ---
    w_an = slab_ref[_R_WAN:_R_WAN + STATE_DIM, :]                # (16, 32)
    b_an = slab_ref[_R_BAN:_R_BAN + 1, :]                        # (1, 32)
    w1_emb = slab_ref[_R_W1E:_R_W1E + LW, :]                     # (32, 32)
    w1_act = slab_ref[_R_W1A:_R_W1A + ACTION_PAD, :]             # (8, 32)
    b1 = slab_ref[_R_B1:_R_B1 + 1, :]                            # (1, 32) (col 25 == 1.0)
    wg = slab_ref[_R_WG:_R_WG + LW, :]                           # (32, 32) gates x features
    w_hh_t = slab_ref[_R_WHH_T:_R_WHH_T + LW, :]                 # (32, 32) gates x H (cols 0:8)

    # --- analyzer + MLP prologue (single fused tanh head, no concats) ---
    # TODO(synk): UnconditionalAnalyzer is not defined in the reference source; it is
    # modeled as two linear+tanh heads concatenated to 2*embedding_dim features.
    emb = jnp.tanh(jnp.dot(states, w_an, preferred_element_type=f32) + b_an)    # (T, 32)
    hid = jnp.maximum(
        jnp.dot(emb, w1_emb, preferred_element_type=f32)
        + jnp.dot(actions, w1_act, preferred_element_type=f32) + b1, 0.0)       # (T, 32); col 25 == 1

    # gate pre-activations for every step at once, gates on the SUBLANE axis:
    #   gx[g, t] = sum_f wg[g, f] * hid[t, f]   (feature 25 carries the fused bias)
    gx = lax.dot_general(wg, hid, (((1,), (1,)), ((), ())),
                         preferred_element_type=f32)                            # (4H, T)

    # identity mask: used to relayout the (H,1) hidden column into a (1,LW) row with a
    # VPU multiply + sublane reduce, so the serial recurrence never touches the MXU.
    rows = lax.broadcasted_iota(jnp.int32, (H, LW), 0)
    cols = lax.broadcasted_iota(jnp.int32, (H, LW), 1)
    eye = jnp.where(rows == cols, 1.0, 0.0).astype(f32)                          # (H, LW)

    h = hc0_ref[:, 0:1]                                                          # (H, 1)
    c = hc0_ref[:, 1:2]                                                          # (H, 1)

    outs = []
    for t in range(T):   # static unroll: T is a trace-time constant; h/c stay in vregs
        # h (H,1) column -> h_row (1,LW) with h in lanes 0:H (mask + sublane reduce)
        h_row = jnp.sum(jnp.broadcast_to(h, (H, LW)) * eye, axis=0, keepdims=True)
        # gh[g] = sum_k h[k] * w_hh[k, g]  -> VPU multiply + lane reduce (MXU-free)
        gh = jnp.sum(jnp.broadcast_to(h_row, (LW, LW)) * w_hh_t, axis=1, keepdims=True)
        g = gx[:, t:t + 1] + gh                                                  # (4H, 1)

        sg = jax.nn.sigmoid(g)
        i_g = sg[0 * H:1 * H, :]          # tile-aligned sublane slices (gate order i,f,g,o)
        f_g = sg[1 * H:2 * H, :]
        o_g = sg[3 * H:4 * H, :]
        g_g = jnp.tanh(g[2 * H:3 * H, :])

        c = f_g * c + i_g * g_g
        h = o_g * jnp.tanh(c)
        if seq_out:
            outs.append(h)

    if seq_out:
        out_ref[...] = jnp.concatenate(outs, axis=1)      # (H, T) — single batched store
    else:
        out_ref[...] = jnp.concatenate([h, c], axis=1)    # (H, 2) final (hidden, cell)


def pack_params(params):
    """Host-side fusion + packing of all parameters into a single (136, 32) f32 slab."""
    slab = np.zeros((SLAB_ROWS, LW), np.float32)

    w_an = np.concatenate([np.asarray(params["w_mu"]), np.asarray(params["w_sig"])], axis=1)
    b_an = np.concatenate([np.asarray(params["b_mu"]), np.asarray(params["b_sig"])], axis=1)
    slab[_R_WAN:_R_WAN + STATE_DIM, :AN_OUT] = w_an
    slab[_R_BAN, :AN_OUT] = b_an[0]

    w1 = np.asarray(params["w1"])                        # (2*EMBED + ACTION, 25)
    slab[_R_W1E:_R_W1E + AN_OUT, :MLP_HIDDEN] = w1[:AN_OUT]
    slab[_R_W1A:_R_W1A + ACTION_DIM, :MLP_HIDDEN] = w1[AN_OUT:]
    slab[_R_B1, :MLP_HIDDEN] = np.asarray(params["b1"])[0]
    slab[_R_B1, MLP_HIDDEN] = 1.0                        # marker: hid[:, 25] == 1 (carries bias)

    # fold the MLP output layer into the LSTM input projection (algebraic fusion)
    w_fused = np.asarray(params["w2"]) @ np.asarray(params["w_ih"])                     # (25, 4H)
    b_fused = np.asarray(params["b2"]) @ np.asarray(params["w_ih"]) + np.asarray(params["b_lstm"])
    wg = np.zeros((LW, LW), np.float32)                  # gates x hid-features
    wg[:, :MLP_HIDDEN] = w_fused.T
    wg[:, MLP_HIDDEN] = b_fused[0]
    slab[_R_WG:_R_WG + LW, :] = wg

    slab[_R_WHH_T:_R_WHH_T + LW, :H] = np.asarray(params["w_hh"]).T                     # (4H, H)
    return jnp.asarray(slab)


def strategy_distiller_forward(slab, hidden, cell, states, actions, mode):
    assert states.shape[0] == actions.shape[0], "states and actions must align"
    assert states.ndim == 2 and states.shape[1] == STATE_DIM
    assert actions.ndim == 2 and actions.shape[1] == ACTION_DIM
    assert mode in (SEARCH_MODE, BACKPROP_MODE)
    assert mode != SEARCH_MODE or states.shape[0] == 1, \
        "there should only be a single state in search mode"

    T = states.shape[0]
    seq_out = mode == BACKPROP_MODE

    # wrapper-side layout plumbing (cheap XLA ops, outside the kernel)
    actions_p = jnp.concatenate(
        [actions, jnp.zeros((T, ACTION_PAD - ACTION_DIM), actions.dtype)], axis=1)
    hc0 = jnp.concatenate([hidden, cell], axis=0).T            # (H, 2) column form

    vmem = pl.BlockSpec(memory_space=pltpu.MemorySpace.VMEM)
    out = pl.pallas_call(
        functools.partial(_strategy_distiller_kernel, seq_out=seq_out),
        out_shape=jax.ShapeDtypeStruct((H, T if seq_out else 2), jnp.float32),
        in_specs=[vmem, vmem, vmem, vmem],
        out_specs=vmem,
    )(states, actions_p, hc0, slab)

    if seq_out:
        return out.T                 # (T, H) LSTM output sequence
    hc = out.T                       # (2, H)
    return hc[0:1], hc[1:2]          # Strategy(final_hidden, final_cell)


def init_params(key):
    ks = jax.random.split(key, 8)

    def lin(k, fan_in, fan_out):
        bound = 1.0 / np.sqrt(fan_in)
        kw, kb = jax.random.split(k)
        w = jax.random.uniform(kw, (fan_in, fan_out), jnp.float32, -bound, bound)
        b = jax.random.uniform(kb, (1, fan_out), jnp.float32, -bound, bound)
        return w, b

    w_mu, b_mu = lin(ks[0], STATE_DIM, EMBED_DIM)
    w_sig, b_sig = lin(ks[1], STATE_DIM, EMBED_DIM)
    w1, b1 = lin(ks[2], 2 * EMBED_DIM + ACTION_DIM, MLP_HIDDEN)
    w2, b2 = lin(ks[3], MLP_HIDDEN, STRATEGY_DIM)

    bound = 1.0 / np.sqrt(H)
    # PyTorch stores weight_ih_l0 as (4H, in); we keep the transposed (in, 4H) layout.
    w_ih = jax.random.uniform(ks[4], (H, 4 * H), jnp.float32, -bound, bound)
    w_hh = jax.random.uniform(ks[5], (H, 4 * H), jnp.float32, -bound, bound)
    b_ih = jax.random.uniform(ks[6], (1, 4 * H), jnp.float32, -bound, bound)
    b_hh = jax.random.uniform(ks[7], (1, 4 * H), jnp.float32, -bound, bound)

    return dict(w_mu=w_mu, b_mu=b_mu, w_sig=w_sig, b_sig=b_sig,
                w1=w1, b1=b1, w2=w2, b2=b2,
                w_ih=w_ih, w_hh=w_hh, b_lstm=b_ih + b_hh)


def reference_forward(params, hidden, cell, states, actions):
    """Pure-JAX reference matching nn.LSTM / nn.Linear semantics (unfused weights)."""
    emb_mu = jnp.tanh(states @ params["w_mu"] + params["b_mu"])
    emb_sig = jnp.tanh(states @ params["w_sig"] + params["b_sig"])
    mlp_in = jnp.concatenate([emb_mu, emb_sig, actions], axis=1)
    hid = jax.nn.relu(mlp_in @ params["w1"] + params["b1"])
    x = hid @ params["w2"] + params["b2"]

    def step(carry, xt):
        h, c = carry
        g = xt[None, :] @ params["w_ih"] + h @ params["w_hh"] + params["b_lstm"]
        i = jax.nn.sigmoid(g[:, :H])
        f = jax.nn.sigmoid(g[:, H:2 * H])
        gg = jnp.tanh(g[:, 2 * H:3 * H])
        o = jax.nn.sigmoid(g[:, 3 * H:])
        c = f * c + i * gg
        h = o * jnp.tanh(c)
        return (h, c), h[0]

    (hN, cN), ys = lax.scan(step, (hidden, cell), x)
    return ys, hN, cN


if __name__ == "__main__":
    key = jax.random.PRNGKey(0)
    kp, k_states, k_actions = jax.random.split(key, 3)
    params = init_params(kp)
    slab = pack_params(params)

    states = jax.random.normal(k_states, (SEQ_LEN, STATE_DIM), jnp.float32)
    actions = jax.random.normal(k_actions, (SEQ_LEN, ACTION_DIM), jnp.float32)
    # init_strategy(): zero hidden and cell of shape (1, STRATEGY_DIM)
    h0 = jnp.zeros((1, STRATEGY_DIM), jnp.float32)
    c0 = jnp.zeros((1, STRATEGY_DIM), jnp.float32)

    # BACKPROP_MODE: full sequence, returns LSTM output (T, STRATEGY_DIM)
    out = strategy_distiller_forward(slab, h0, c0, states, actions, BACKPROP_MODE)
    out = jax.block_until_ready(out)

    # SEARCH_MODE: single state, returns Strategy(final_hidden, final_cell)
    hN, cN = strategy_distiller_forward(slab, h0, c0, states[:1], actions[:1], SEARCH_MODE)
    jax.block_until_ready((hN, cN))

    # correctness check against pure-JAX reference (unfused weights)
    ref_out, ref_h, ref_c = reference_forward(params, h0, c0, states, actions)
    assert np.allclose(np.asarray(out), np.asarray(ref_out), rtol=1e-3, atol=1e-3)
    ref_out1, ref_h1, ref_c1 = reference_forward(params, h0, c0, states[:1], actions[:1])
    assert np.allclose(np.asarray(hN), np.asarray(ref_h1), rtol=1e-3, atol=1e-3)
    assert np.allclose(np.asarray(cN), np.asarray(ref_c1), rtol=1e-3, atol=1e-3)

    print("KERNEL_OK")
</pallas_src>

<mosaic_0001>
module attributes {stable_mosaic.version = 11 : i64} {
  func.func @_strategy_distiller_kernel(%arg0: memref<8x16xf32, #tpu.memory_space<vmem>>, %arg1: memref<8x8xf32, #tpu.memory_space<vmem>>, %arg2: memref<8x2xf32, #tpu.memory_space<vmem>>, %arg3: memref<136x32xf32, #tpu.memory_space<vmem>>, %arg4: memref<8x8xf32, #tpu.memory_space<vmem>>) attributes {dimension_semantics = [], scalar_prefetch = 0 : i64, scratch_operands = 0 : i64, tpu.core_type = #tpu.core_type<tc>} {
    %c0 = arith.constant 0 : index
    %c0_0 = arith.constant 0 : index
    %0 = vector.load %arg0[%c0, %c0_0] : memref<8x16xf32, #tpu.memory_space<vmem>>, vector<8x16xf32>
    %c0_1 = arith.constant 0 : index
    %c0_2 = arith.constant 0 : index
    %1 = vector.load %arg1[%c0_1, %c0_2] : memref<8x8xf32, #tpu.memory_space<vmem>>, vector<8x8xf32>
    %c0_3 = arith.constant 0 : index
    %c0_4 = arith.constant 0 : index
    %2 = vector.load %arg3[%c0_3, %c0_4] : memref<136x32xf32, #tpu.memory_space<vmem>>, vector<16x32xf32>
    %c16 = arith.constant 16 : index
    %c0_5 = arith.constant 0 : index
    %3 = vector.load %arg3[%c16, %c0_5] : memref<136x32xf32, #tpu.memory_space<vmem>>, vector<1x32xf32>
    %c24 = arith.constant 24 : index
    %c0_6 = arith.constant 0 : index
    %4 = vector.load %arg3[%c24, %c0_6] : memref<136x32xf32, #tpu.memory_space<vmem>>, vector<32x32xf32>
    %c56 = arith.constant 56 : index
    %c0_7 = arith.constant 0 : index
    %5 = vector.load %arg3[%c56, %c0_7] : memref<136x32xf32, #tpu.memory_space<vmem>>, vector<8x32xf32>
    %c64 = arith.constant 64 : index
    %c0_8 = arith.constant 0 : index
    %6 = vector.load %arg3[%c64, %c0_8] : memref<136x32xf32, #tpu.memory_space<vmem>>, vector<1x32xf32>
    %c72 = arith.constant 72 : index
    %c0_9 = arith.constant 0 : index
    %7 = vector.load %arg3[%c72, %c0_9] : memref<136x32xf32, #tpu.memory_space<vmem>>, vector<32x32xf32>
    %c104 = arith.constant 104 : index
    %c0_10 = arith.constant 0 : index
    %8 = vector.load %arg3[%c104, %c0_10] : memref<136x32xf32, #tpu.memory_space<vmem>>, vector<32x32xf32>
    %cst = arith.constant dense<0.000000e+00> : vector<8x32xf32>
    %9 = tpu.matmul %0, %2, %cst {dimension_numbers = #tpu.dot_dimension_numbers<[1], [0], [0], [1], [0, 0, 1, 1], [], []>} : vector<8x16xf32>, vector<16x32xf32>, vector<8x32xf32> -> vector<8x32xf32>
    %10 = vector.broadcast %3 : vector<1x32xf32> to vector<8x32xf32>
    %11 = arith.addf %9, %10 : vector<8x32xf32>
    %12 = math.tanh %11 : vector<8x32xf32>
    %cst_11 = arith.constant dense<0.000000e+00> : vector<8x32xf32>
    %13 = tpu.matmul %12, %4, %cst_11 {dimension_numbers = #tpu.dot_dimension_numbers<[1], [0], [0], [1], [0, 0, 1, 1], [], []>} : vector<8x32xf32>, vector<32x32xf32>, vector<8x32xf32> -> vector<8x32xf32>
    %cst_12 = arith.constant dense<0.000000e+00> : vector<8x32xf32>
    %14 = tpu.matmul %1, %5, %cst_12 {dimension_numbers = #tpu.dot_dimension_numbers<[1], [0], [0], [1], [0, 0, 1, 1], [], []>} : vector<8x8xf32>, vector<8x32xf32>, vector<8x32xf32> -> vector<8x32xf32>
    %15 = arith.addf %13, %14 : vector<8x32xf32>
    %16 = vector.broadcast %6 : vector<1x32xf32> to vector<8x32xf32>
    %17 = arith.addf %15, %16 : vector<8x32xf32>
    %cst_13 = arith.constant 0.000000e+00 : f32
    %18 = vector.broadcast %cst_13 : f32 to vector<8x32xf32>
    %19 = arith.maximumf %17, %18 : vector<8x32xf32>
    %cst_14 = arith.constant dense<0.000000e+00> : vector<32x8xf32>
    %20 = tpu.matmul %7, %19, %cst_14 {dimension_numbers = #tpu.dot_dimension_numbers<[1], [1], [0], [0], [0, 0, 1, 0], [], []>} : vector<32x32xf32>, vector<8x32xf32>, vector<32x8xf32> -> vector<32x8xf32>
    %21 = tpu.iota {dimensions = array<i32: 0>} : vector<8x32xi32>
    %22 = tpu.iota {dimensions = array<i32: 1>} : vector<8x32xi32>
    %23 = arith.cmpi eq, %21, %22 : vector<8x32xi32>
    %cst_15 = arith.constant 1.000000e+00 : f32
    %cst_16 = arith.constant 0.000000e+00 : f32
    %24 = vector.broadcast %cst_15 : f32 to vector<8x32xf32>
    %25 = vector.broadcast %cst_16 : f32 to vector<8x32xf32>
    %26 = arith.select %23, %24, %25 : vector<8x32xi1>, vector<8x32xf32>
    %c0_17 = arith.constant 0 : index
    %c0_18 = arith.constant 0 : index
    %27 = vector.load %arg2[%c0_17, %c0_18] : memref<8x2xf32, #tpu.memory_space<vmem>>, vector<8x1xf32>
    %c0_19 = arith.constant 0 : index
    %c1 = arith.constant 1 : index
    %28 = vector.load %arg2[%c0_19, %c1] : memref<8x2xf32, #tpu.memory_space<vmem>>, vector<8x1xf32>
    %29 = vector.shape_cast %27 : vector<8x1xf32> to vector<8x1xf32>
    %30 = vector.broadcast %29 : vector<8x1xf32> to vector<8x32xf32>
    %31 = arith.mulf %30, %26 : vector<8x32xf32>
    %cst_20 = arith.constant dense<0.000000e+00> : vector<32xf32>
    %32 = vector.multi_reduction <add>, %31, %cst_20 [0] : vector<8x32xf32> to vector<32xf32>
    %33 = vector.shape_cast %32 : vector<32xf32> to vector<1x32xf32>
    %34 = vector.shape_cast %33 : vector<1x32xf32> to vector<1x32xf32>
    %35 = vector.broadcast %34 : vector<1x32xf32> to vector<32x32xf32>
    %36 = arith.mulf %35, %8 : vector<32x32xf32>
    %cst_21 = arith.constant dense<0.000000e+00> : vector<32xf32>
    %37 = vector.multi_reduction <add>, %36, %cst_21 [1] : vector<32x32xf32> to vector<32xf32>
    %38 = vector.shape_cast %37 : vector<32xf32> to vector<32x1xf32>
    %39 = vector.extract_strided_slice %20 {offsets = [0, 0], sizes = [32, 1], strides = [1, 1]} : vector<32x8xf32> to vector<32x1xf32>
    %40 = arith.addf %39, %38 : vector<32x1xf32>
    %41 = arith.negf %40 : vector<32x1xf32>
    %42 = math.exp %41 : vector<32x1xf32>
    %cst_22 = arith.constant 1.000000e+00 : f32
    %43 = vector.broadcast %cst_22 : f32 to vector<32x1xf32>
    %44 = arith.addf %43, %42 : vector<32x1xf32>
    %45 = arith.divf %43, %44 : vector<32x1xf32>
    %46 = vector.extract_strided_slice %45 {offsets = [0, 0], sizes = [8, 1], strides = [1, 1]} : vector<32x1xf32> to vector<8x1xf32>
    %47 = vector.extract_strided_slice %45 {offsets = [8, 0], sizes = [8, 1], strides = [1, 1]} : vector<32x1xf32> to vector<8x1xf32>
    %48 = vector.extract_strided_slice %45 {offsets = [24, 0], sizes = [8, 1], strides = [1, 1]} : vector<32x1xf32> to vector<8x1xf32>
    %49 = vector.extract_strided_slice %40 {offsets = [16, 0], sizes = [8, 1], strides = [1, 1]} : vector<32x1xf32> to vector<8x1xf32>
    %50 = math.tanh %49 : vector<8x1xf32>
    %51 = arith.mulf %47, %28 : vector<8x1xf32>
    %52 = arith.mulf %46, %50 : vector<8x1xf32>
    %53 = arith.addf %51, %52 : vector<8x1xf32>
    %54 = math.tanh %53 : vector<8x1xf32>
    %55 = arith.mulf %48, %54 : vector<8x1xf32>
    %56 = vector.shape_cast %55 : vector<8x1xf32> to vector<8x1xf32>
    %57 = vector.broadcast %56 : vector<8x1xf32> to vector<8x32xf32>
    %58 = arith.mulf %57, %26 : vector<8x32xf32>
    %cst_23 = arith.constant dense<0.000000e+00> : vector<32xf32>
    %59 = vector.multi_reduction <add>, %58, %cst_23 [0] : vector<8x32xf32> to vector<32xf32>
    %60 = vector.shape_cast %59 : vector<32xf32> to vector<1x32xf32>
    %61 = vector.shape_cast %60 : vector<1x32xf32> to vector<1x32xf32>
    %62 = vector.broadcast %61 : vector<1x32xf32> to vector<32x32xf32>
    %63 = arith.mulf %62, %8 : vector<32x32xf32>
    %cst_24 = arith.constant dense<0.000000e+00> : vector<32xf32>
    %64 = vector.multi_reduction <add>, %63, %cst_24 [1] : vector<32x32xf32> to vector<32xf32>
    %65 = vector.shape_cast %64 : vector<32xf32> to vector<32x1xf32>
    %66 = vector.extract_strided_slice %20 {offsets = [0, 1], sizes = [32, 1], strides = [1, 1]} : vector<32x8xf32> to vector<32x1xf32>
    %67 = arith.addf %66, %65 : vector<32x1xf32>
    %68 = arith.negf %67 : vector<32x1xf32>
    %69 = math.exp %68 : vector<32x1xf32>
    %cst_25 = arith.constant 1.000000e+00 : f32
    %70 = vector.broadcast %cst_25 : f32 to vector<32x1xf32>
    %71 = arith.addf %70, %69 : vector<32x1xf32>
    %72 = arith.divf %70, %71 : vector<32x1xf32>
    %73 = vector.extract_strided_slice %72 {offsets = [0, 0], sizes = [8, 1], strides = [1, 1]} : vector<32x1xf32> to vector<8x1xf32>
    %74 = vector.extract_strided_slice %72 {offsets = [8, 0], sizes = [8, 1], strides = [1, 1]} : vector<32x1xf32> to vector<8x1xf32>
    %75 = vector.extract_strided_slice %72 {offsets = [24, 0], sizes = [8, 1], strides = [1, 1]} : vector<32x1xf32> to vector<8x1xf32>
    %76 = vector.extract_strided_slice %67 {offsets = [16, 0], sizes = [8, 1], strides = [1, 1]} : vector<32x1xf32> to vector<8x1xf32>
    %77 = math.tanh %76 : vector<8x1xf32>
    %78 = arith.mulf %74, %53 : vector<8x1xf32>
    %79 = arith.mulf %73, %77 : vector<8x1xf32>
    %80 = arith.addf %78, %79 : vector<8x1xf32>
    %81 = math.tanh %80 : vector<8x1xf32>
    %82 = arith.mulf %75, %81 : vector<8x1xf32>
    %83 = vector.shape_cast %82 : vector<8x1xf32> to vector<8x1xf32>
    %84 = vector.broadcast %83 : vector<8x1xf32> to vector<8x32xf32>
    %85 = arith.mulf %84, %26 : vector<8x32xf32>
    %cst_26 = arith.constant dense<0.000000e+00> : vector<32xf32>
    %86 = vector.multi_reduction <add>, %85, %cst_26 [0] : vector<8x32xf32> to vector<32xf32>
    %87 = vector.shape_cast %86 : vector<32xf32> to vector<1x32xf32>
    %88 = vector.shape_cast %87 : vector<1x32xf32> to vector<1x32xf32>
    %89 = vector.broadcast %88 : vector<1x32xf32> to vector<32x32xf32>
    %90 = arith.mulf %89, %8 : vector<32x32xf32>
    %cst_27 = arith.constant dense<0.000000e+00> : vector<32xf32>
    %91 = vector.multi_reduction <add>, %90, %cst_27 [1] : vector<32x32xf32> to vector<32xf32>
    %92 = vector.shape_cast %91 : vector<32xf32> to vector<32x1xf32>
    %93 = vector.extract_strided_slice %20 {offsets = [0, 2], sizes = [32, 1], strides = [1, 1]} : vector<32x8xf32> to vector<32x1xf32>
    %94 = arith.addf %93, %92 : vector<32x1xf32>
    %95 = arith.negf %94 : vector<32x1xf32>
    %96 = math.exp %95 : vector<32x1xf32>
    %cst_28 = arith.constant 1.000000e+00 : f32
    %97 = vector.broadcast %cst_28 : f32 to vector<32x1xf32>
    %98 = arith.addf %97, %96 : vector<32x1xf32>
    %99 = arith.divf %97, %98 : vector<32x1xf32>
    %100 = vector.extract_strided_slice %99 {offsets = [0, 0], sizes = [8, 1], strides = [1, 1]} : vector<32x1xf32> to vector<8x1xf32>
    %101 = vector.extract_strided_slice %99 {offsets = [8, 0], sizes = [8, 1], strides = [1, 1]} : vector<32x1xf32> to vector<8x1xf32>
    %102 = vector.extract_strided_slice %99 {offsets = [24, 0], sizes = [8, 1], strides = [1, 1]} : vector<32x1xf32> to vector<8x1xf32>
    %103 = vector.extract_strided_slice %94 {offsets = [16, 0], sizes = [8, 1], strides = [1, 1]} : vector<32x1xf32> to vector<8x1xf32>
    %104 = math.tanh %103 : vector<8x1xf32>
    %105 = arith.mulf %101, %80 : vector<8x1xf32>
    %106 = arith.mulf %100, %104 : vector<8x1xf32>
    %107 = arith.addf %105, %106 : vector<8x1xf32>
    %108 = math.tanh %107 : vector<8x1xf32>
    %109 = arith.mulf %102, %108 : vector<8x1xf32>
    %110 = vector.shape_cast %109 : vector<8x1xf32> to vector<8x1xf32>
    %111 = vector.broadcast %110 : vector<8x1xf32> to vector<8x32xf32>
    %112 = arith.mulf %111, %26 : vector<8x32xf32>
    %cst_29 = arith.constant dense<0.000000e+00> : vector<32xf32>
    %113 = vector.multi_reduction <add>, %112, %cst_29 [0] : vector<8x32xf32> to vector<32xf32>
    %114 = vector.shape_cast %113 : vector<32xf32> to vector<1x32xf32>
    %115 = vector.shape_cast %114 : vector<1x32xf32> to vector<1x32xf32>
    %116 = vector.broadcast %115 : vector<1x32xf32> to vector<32x32xf32>
    %117 = arith.mulf %116, %8 : vector<32x32xf32>
    %cst_30 = arith.constant dense<0.000000e+00> : vector<32xf32>
    %118 = vector.multi_reduction <add>, %117, %cst_30 [1] : vector<32x32xf32> to vector<32xf32>
    %119 = vector.shape_cast %118 : vector<32xf32> to vector<32x1xf32>
    %120 = vector.extract_strided_slice %20 {offsets = [0, 3], sizes = [32, 1], strides = [1, 1]} : vector<32x8xf32> to vector<32x1xf32>
    %121 = arith.addf %120, %119 : vector<32x1xf32>
    %122 = arith.negf %121 : vector<32x1xf32>
    %123 = math.exp %122 : vector<32x1xf32>
    %cst_31 = arith.constant 1.000000e+00 : f32
    %124 = vector.broadcast %cst_31 : f32 to vector<32x1xf32>
    %125 = arith.addf %124, %123 : vector<32x1xf32>
    %126 = arith.divf %124, %125 : vector<32x1xf32>
    %127 = vector.extract_strided_slice %126 {offsets = [0, 0], sizes = [8, 1], strides = [1, 1]} : vector<32x1xf32> to vector<8x1xf32>
    %128 = vector.extract_strided_slice %126 {offsets = [8, 0], sizes = [8, 1], strides = [1, 1]} : vector<32x1xf32> to vector<8x1xf32>
    %129 = vector.extract_strided_slice %126 {offsets = [24, 0], sizes = [8, 1], strides = [1, 1]} : vector<32x1xf32> to vector<8x1xf32>
    %130 = vector.extract_strided_slice %121 {offsets = [16, 0], sizes = [8, 1], strides = [1, 1]} : vector<32x1xf32> to vector<8x1xf32>
    %131 = math.tanh %130 : vector<8x1xf32>
    %132 = arith.mulf %128, %107 : vector<8x1xf32>
    %133 = arith.mulf %127, %131 : vector<8x1xf32>
    %134 = arith.addf %132, %133 : vector<8x1xf32>
    %135 = math.tanh %134 : vector<8x1xf32>
    %136 = arith.mulf %129, %135 : vector<8x1xf32>
    %137 = vector.shape_cast %136 : vector<8x1xf32> to vector<8x1xf32>
    %138 = vector.broadcast %137 : vector<8x1xf32> to vector<8x32xf32>
    %139 = arith.mulf %138, %26 : vector<8x32xf32>
    %cst_32 = arith.constant dense<0.000000e+00> : vector<32xf32>
    %140 = vector.multi_reduction <add>, %139, %cst_32 [0] : vector<8x32xf32> to vector<32xf32>
    %141 = vector.shape_cast %140 : vector<32xf32> to vector<1x32xf32>
    %142 = vector.shape_cast %141 : vector<1x32xf32> to vector<1x32xf32>
    %143 = vector.broadcast %142 : vector<1x32xf32> to vector<32x32xf32>
    %144 = arith.mulf %143, %8 : vector<32x32xf32>
    %cst_33 = arith.constant dense<0.000000e+00> : vector<32xf32>
    %145 = vector.multi_reduction <add>, %144, %cst_33 [1] : vector<32x32xf32> to vector<32xf32>
    %146 = vector.shape_cast %145 : vector<32xf32> to vector<32x1xf32>
    %147 = vector.extract_strided_slice %20 {offsets = [0, 4], sizes = [32, 1], strides = [1, 1]} : vector<32x8xf32> to vector<32x1xf32>
    %148 = arith.addf %147, %146 : vector<32x1xf32>
    %149 = arith.negf %148 : vector<32x1xf32>
    %150 = math.exp %149 : vector<32x1xf32>
    %cst_34 = arith.constant 1.000000e+00 : f32
    %151 = vector.broadcast %cst_34 : f32 to vector<32x1xf32>
    %152 = arith.addf %151, %150 : vector<32x1xf32>
    %153 = arith.divf %151, %152 : vector<32x1xf32>
    %154 = vector.extract_strided_slice %153 {offsets = [0, 0], sizes = [8, 1], strides = [1, 1]} : vector<32x1xf32> to vector<8x1xf32>
    %155 = vector.extract_strided_slice %153 {offsets = [8, 0], sizes = [8, 1], strides = [1, 1]} : vector<32x1xf32> to vector<8x1xf32>
    %156 = vector.extract_strided_slice %153 {offsets = [24, 0], sizes = [8, 1], strides = [1, 1]} : vector<32x1xf32> to vector<8x1xf32>
    %157 = vector.extract_strided_slice %148 {offsets = [16, 0], sizes = [8, 1], strides = [1, 1]} : vector<32x1xf32> to vector<8x1xf32>
    %158 = math.tanh %157 : vector<8x1xf32>
    %159 = arith.mulf %155, %134 : vector<8x1xf32>
    %160 = arith.mulf %154, %158 : vector<8x1xf32>
    %161 = arith.addf %159, %160 : vector<8x1xf32>
    %162 = math.tanh %161 : vector<8x1xf32>
    %163 = arith.mulf %156, %162 : vector<8x1xf32>
    %164 = vector.shape_cast %163 : vector<8x1xf32> to vector<8x1xf32>
    %165 = vector.broadcast %164 : vector<8x1xf32> to vector<8x32xf32>
    %166 = arith.mulf %165, %26 : vector<8x32xf32>
    %cst_35 = arith.constant dense<0.000000e+00> : vector<32xf32>
    %167 = vector.multi_reduction <add>, %166, %cst_35 [0] : vector<8x32xf32> to vector<32xf32>
    %168 = vector.shape_cast %167 : vector<32xf32> to vector<1x32xf32>
    %169 = vector.shape_cast %168 : vector<1x32xf32> to vector<1x32xf32>
    %170 = vector.broadcast %169 : vector<1x32xf32> to vector<32x32xf32>
    %171 = arith.mulf %170, %8 : vector<32x32xf32>
    %cst_36 = arith.constant dense<0.000000e+00> : vector<32xf32>
    %172 = vector.multi_reduction <add>, %171, %cst_36 [1] : vector<32x32xf32> to vector<32xf32>
    %173 = vector.shape_cast %172 : vector<32xf32> to vector<32x1xf32>
    %174 = vector.extract_strided_slice %20 {offsets = [0, 5], sizes = [32, 1], strides = [1, 1]} : vector<32x8xf32> to vector<32x1xf32>
    %175 = arith.addf %174, %173 : vector<32x1xf32>
    %176 = arith.negf %175 : vector<32x1xf32>
    %177 = math.exp %176 : vector<32x1xf32>
    %cst_37 = arith.constant 1.000000e+00 : f32
    %178 = vector.broadcast %cst_37 : f32 to vector<32x1xf32>
    %179 = arith.addf %178, %177 : vector<32x1xf32>
    %180 = arith.divf %178, %179 : vector<32x1xf32>
    %181 = vector.extract_strided_slice %180 {offsets = [0, 0], sizes = [8, 1], strides = [1, 1]} : vector<32x1xf32> to vector<8x1xf32>
    %182 = vector.extract_strided_slice %180 {offsets = [8, 0], sizes = [8, 1], strides = [1, 1]} : vector<32x1xf32> to vector<8x1xf32>
    %183 = vector.extract_strided_slice %180 {offsets = [24, 0], sizes = [8, 1], strides = [1, 1]} : vector<32x1xf32> to vector<8x1xf32>
    %184 = vector.extract_strided_slice %175 {offsets = [16, 0], sizes = [8, 1], strides = [1, 1]} : vector<32x1xf32> to vector<8x1xf32>
    %185 = math.tanh %184 : vector<8x1xf32>
    %186 = arith.mulf %182, %161 : vector<8x1xf32>
    %187 = arith.mulf %181, %185 : vector<8x1xf32>
    %188 = arith.addf %186, %187 : vector<8x1xf32>
    %189 = math.tanh %188 : vector<8x1xf32>
    %190 = arith.mulf %183, %189 : vector<8x1xf32>
    %191 = vector.shape_cast %190 : vector<8x1xf32> to vector<8x1xf32>
    %192 = vector.broadcast %191 : vector<8x1xf32> to vector<8x32xf32>
    %193 = arith.mulf %192, %26 : vector<8x32xf32>
    %cst_38 = arith.constant dense<0.000000e+00> : vector<32xf32>
    %194 = vector.multi_reduction <add>, %193, %cst_38 [0] : vector<8x32xf32> to vector<32xf32>
    %195 = vector.shape_cast %194 : vector<32xf32> to vector<1x32xf32>
    %196 = vector.shape_cast %195 : vector<1x32xf32> to vector<1x32xf32>
    %197 = vector.broadcast %196 : vector<1x32xf32> to vector<32x32xf32>
    %198 = arith.mulf %197, %8 : vector<32x32xf32>
    %cst_39 = arith.constant dense<0.000000e+00> : vector<32xf32>
    %199 = vector.multi_reduction <add>, %198, %cst_39 [1] : vector<32x32xf32> to vector<32xf32>
    %200 = vector.shape_cast %199 : vector<32xf32> to vector<32x1xf32>
    %201 = vector.extract_strided_slice %20 {offsets = [0, 6], sizes = [32, 1], strides = [1, 1]} : vector<32x8xf32> to vector<32x1xf32>
    %202 = arith.addf %201, %200 : vector<32x1xf32>
    %203 = arith.negf %202 : vector<32x1xf32>
    %204 = math.exp %203 : vector<32x1xf32>
    %cst_40 = arith.constant 1.000000e+00 : f32
    %205 = vector.broadcast %cst_40 : f32 to vector<32x1xf32>
    %206 = arith.addf %205, %204 : vector<32x1xf32>
    %207 = arith.divf %205, %206 : vector<32x1xf32>
    %208 = vector.extract_strided_slice %207 {offsets = [0, 0], sizes = [8, 1], strides = [1, 1]} : vector<32x1xf32> to vector<8x1xf32>
    %209 = vector.extract_strided_slice %207 {offsets = [8, 0], sizes = [8, 1], strides = [1, 1]} : vector<32x1xf32> to vector<8x1xf32>
    %210 = vector.extract_strided_slice %207 {offsets = [24, 0], sizes = [8, 1], strides = [1, 1]} : vector<32x1xf32> to vector<8x1xf32>
    %211 = vector.extract_strided_slice %202 {offsets = [16, 0], sizes = [8, 1], strides = [1, 1]} : vector<32x1xf32> to vector<8x1xf32>
    %212 = math.tanh %211 : vector<8x1xf32>
    %213 = arith.mulf %209, %188 : vector<8x1xf32>
    %214 = arith.mulf %208, %212 : vector<8x1xf32>
    %215 = arith.addf %213, %214 : vector<8x1xf32>
    %216 = math.tanh %215 : vector<8x1xf32>
    %217 = arith.mulf %210, %216 : vector<8x1xf32>
    %218 = vector.shape_cast %217 : vector<8x1xf32> to vector<8x1xf32>
    %219 = vector.broadcast %218 : vector<8x1xf32> to vector<8x32xf32>
    %220 = arith.mulf %219, %26 : vector<8x32xf32>
    %cst_41 = arith.constant dense<0.000000e+00> : vector<32xf32>
    %221 = vector.multi_reduction <add>, %220, %cst_41 [0] : vector<8x32xf32> to vector<32xf32>
    %222 = vector.shape_cast %221 : vector<32xf32> to vector<1x32xf32>
    %223 = vector.shape_cast %222 : vector<1x32xf32> to vector<1x32xf32>
    %224 = vector.broadcast %223 : vector<1x32xf32> to vector<32x32xf32>
    %225 = arith.mulf %224, %8 : vector<32x32xf32>
    %cst_42 = arith.constant dense<0.000000e+00> : vector<32xf32>
    %226 = vector.multi_reduction <add>, %225, %cst_42 [1] : vector<32x32xf32> to vector<32xf32>
    %227 = vector.shape_cast %226 : vector<32xf32> to vector<32x1xf32>
    %228 = vector.extract_strided_slice %20 {offsets = [0, 7], sizes = [32, 1], strides = [1, 1]} : vector<32x8xf32> to vector<32x1xf32>
    %229 = arith.addf %228, %227 : vector<32x1xf32>
    %230 = arith.negf %229 : vector<32x1xf32>
    %231 = math.exp %230 : vector<32x1xf32>
    %cst_43 = arith.constant 1.000000e+00 : f32
    %232 = vector.broadcast %cst_43 : f32 to vector<32x1xf32>
    %233 = arith.addf %232, %231 : vector<32x1xf32>
    %234 = arith.divf %232, %233 : vector<32x1xf32>
    %235 = vector.extract_strided_slice %234 {offsets = [0, 0], sizes = [8, 1], strides = [1, 1]} : vector<32x1xf32> to vector<8x1xf32>
    %236 = vector.extract_strided_slice %234 {offsets = [8, 0], sizes = [8, 1], strides = [1, 1]} : vector<32x1xf32> to vector<8x1xf32>
    %237 = vector.extract_strided_slice %234 {offsets = [24, 0], sizes = [8, 1], strides = [1, 1]} : vector<32x1xf32> to vector<8x1xf32>
    %238 = vector.extract_strided_slice %229 {offsets = [16, 0], sizes = [8, 1], strides = [1, 1]} : vector<32x1xf32> to vector<8x1xf32>
    %239 = math.tanh %238 : vector<8x1xf32>
    %240 = arith.mulf %236, %215 : vector<8x1xf32>
    %241 = arith.mulf %235, %239 : vector<8x1xf32>
    %242 = arith.addf %240, %241 : vector<8x1xf32>
    %243 = math.tanh %242 : vector<8x1xf32>
    %244 = arith.mulf %237, %243 : vector<8x1xf32>
    %245 = tpu.concatenate %55, %82, %109, %136, %163, %190, %217, %244 in 1 : vector<8x1xf32>, vector<8x1xf32>, vector<8x1xf32>, vector<8x1xf32>, vector<8x1xf32>, vector<8x1xf32>, vector<8x1xf32>, vector<8x1xf32> -> vector<8x8xf32>
    %c0_44 = arith.constant 0 : index
    %c0_45 = arith.constant 0 : index
    %246 = vector.load %arg4[%c0_44, %c0_45] : memref<8x8xf32, #tpu.memory_space<vmem>>, vector<8x8xf32>
    tpu.vector_store %arg4[%c0_44, %c0_45], %245 {strides = array<i32>} : memref<8x8xf32, #tpu.memory_space<vmem>>, vector<8x8xf32>,
    return
  }
}

</mosaic_0001>

<bundles_post_ra>
// kernel: tpu_custom_call.1
= control target key start
LH: loop header
LB: loop body
LE: loop exit
PB: predicated region body
PF: predicated region fallthrough
CT: control target
= control target key end

     0   :  { %v1146_v1 = vmov 0.0   ;;  %vm1147_vm0 = vmmov 0   ;;  %s1418_s0 = inlined_call_operand.vmem [shape: f32[8,16], index: 0, kind: input, shape index: {}]   ;;  %s1419_s1 = inlined_call_operand.vmem [shape: f32[8,8], index: 1, kind: input, shape index: {}]   ;;  %s1420_s2 = inlined_call_operand.vmem [shape: f32[8,2], index: 2, kind: input, shape index: {}]   ;;  %s1421_s3 = inlined_call_operand.vmem [shape: f32[136,32], index: 3, kind: input, shape index: {}]   ;;  %s1422_s4 = inlined_call_operand.hbm [shape: f32[8,8], index: 4, kind: output, shape index: {}]  }
   0x1   :  { %v21_v0 = vld [vmem:[%s1421_s3 + $0x8] sm:$0xff]  ;;  %942 = vmatprep.subr.mxu0 %v1146_v1  ;;  %v20_v2 = vld [vmem:[%s1421_s3] sm:$0xff]  ;;  %946 = vmatprep.mubr.msk.f32.mxu0 %vm1147_vm0, %v1146_v1 }
   0x2   :  { %9 = vsyncpa [#allocation3], 0  ;;  %943 = vmatpush3.msra.mxu0 %v21_v0  ;;  %v18_v3 = vld [vmem:[%s1418_s0] sm:$0xff]  ;;  %vm41_vm1 = vcmask 130048   ;;  %949 = vmatprep.subr.mxu1 %v1146_v1  ;;  %v27_v4 = vld [vmem:[%s1421_s3 + $0x38] sm:$0xff]  ;;  %vm116_vm2 = vcmask 64512   ;;  %v370_v20 = vlaneseq }
   0x3   :  { %944 = vmatprep.subr.mxu0 %v1146_v1  ;;  %951 = vmatprep.mubr.msk.f32.mxu1 %vm1147_vm0, %v1146_v1  ;;  %v19_v5 = vld [vmem:[%s1419_s1] sm:$0xff]  ;;  %v26_v6 = vld [vmem:[%s1421_s3 + $0x30] sm:$0xff]  ;;  %v25_v7 = vld [vmem:[%s1421_s3 + $0x28] sm:$0xff]  ;;  %v1148_v11 = vmov 0   ;;  %vm190_vm3 = vcmask 261120   ;;  %s1149_s18 = smov 127  }
   0x4   :  { %945 = vmatpush3.msra.mxu0 %v20_v2  ;;  %950 = vmatpush3.msra.mxu1 %v27_v4  ;;  %v24_v8 = vld [vmem:[%s1421_s3 + $0x20] sm:$0xff]  ;;  %v23_v9 = vld [vmem:[%s1421_s3 + $0x18] sm:$0xff]  ;;  %v893_v12 = vld [vmem:[%s1421_s3 + $0x10] ss:$0 sm:$0xff]  ;;  %v371_v21 = vshrl.u32 %v370_v20, 7  ;;  %v373_v22 = vand.u32 127, %v370_v20 }
   0x5   :  { %947 = vmatmul.mubr.msk.f32.vlgmr.msra.gmra.mxu0 %vm41_vm1, %v18_v3  ;;  %952 = vmatmul.mubr.msk.f32.vlgmr.msra.gmra.mxu1 %vm116_vm2, %v19_v5  ;;  %v376_v10 = vld [vmem:[%s1420_s2] sm:$0xff]  ;;  %v29_v19 = vld [vmem:[%s1421_s3 + $0x48] sm:$0xff]  ;;  %v1232_v32 = vld [vmem:[%s1421_s3 + $0x70] sm:$0xff]  ;;  %vm864_vm5 = vcmask 7168   ;;  %vm866_vm6 = vcmask 15360   ;;  %vm868_vm7 = vcmask 23552  }
   0x6   :  { %954 = vmatprep.subr.mxu1 %v1146_v1  ;;  %962 = vmatprep.mubr.msk.f32.mxu1 %vm1147_vm0, %v1146_v1  ;;  %vm374_vm4 = vcmp.eq.s32.totalorder %v371_v21, %v373_v22  ;;  %v1237_v33 = vld [vmem:[%s1421_s3 + $0x78] sm:$0xff]  ;;  %v1242_v34 = vld [vmem:[%s1421_s3 + $0x68] sm:$0xff]  ;;  %v1250_v39 = vld [vmem:[%s1421_s3 + $0x80] sm:$0xff]  ;;  %vm870_vm8 = vcmask 31744   ;;  %vm872_vm9 = vcmask 39936   ;;  %vm874_vm10 = vcmask 48128  }
   0x7   :  { %955 = vmatpush3.msra.mxu1 %v26_v6  ;;  %985 = vset.pattern.permute.xlu0 %v1148_v11  ;;  %v1225_v24 = vsel %vm374_vm4, 1.0, %v1146_v1  ;;  %v897_v45 = vld [vmem:[%s1421_s3 + $0x40] ss:$0 sm:$0xff]  ;;  %v30_v51 = vld [vmem:[%s1421_s3 + $0x50] sm:$0xff]  ;;  %v31_v52 = vld [vmem:[%s1421_s3 + $0x58] sm:$0xff]  ;;  %s1157_s0 = smov [#allocation2]  }
   0x8   :  { %956 = vmatprep.subr.mxu1 %v1146_v1  ;;  %986 = vset.pattern.permute.xlu1 %v1148_v11  ;;  %v32_v53 = vld [vmem:[%s1421_s3 + $0x60] sm:$0xff]  ;;  %s1150_s3 = smov 1   ;;  %s885_s27 = sshll.u32 %s1157_s0, 4  ;;  %vm876_vm11 = vcmask 56320   ;;  %s886_s27 = int_to_ptr.vmem [resolvable:$true] %s885_s27 }
   0x9   :  { %957 = vmatpush3.msra.mxu1 %v25_v7  ;;  %379 = vperm.xlu0 %985, %v376_v10   ;;  %s1124_s28 = scalar_lea.vmem %s886_s27, 128  ;;  %p1129_p1 = scmp.lt.s32.totalorder %s886_s27, %s886_s27 }
   0xa   :  { %958 = vmatprep.subr.mxu1 %v1146_v1  ;;  %967 = vmatprep.mubr.msk.f32.mxu0 %vm190_vm3, %v29_v19  ;;  %p1125_p0 = scmp.ne.s32.totalorder %s886_s27, %s1124_s28  ;;  %p1130_p2 = scmp.lt.s32.totalorder %s1124_s28, %s1124_s28 }
   0xb   :  { %959 = vmatpush3.msra.mxu1 %v24_v8 }
   0xc   :  { %960 = vmatprep.subr.mxu1 %v1146_v1  ;;  %p1131_p3 = por %p1130_p2, %p1129_p1 }
   0xd   :  { %961 = vmatpush3.msra.mxu1 %v23_v9 }
   0xe   :  { %p1132_p4 = pnand %p1131_p3, %p1125_p0 }
  0x84   :  { %v380_v23 = vpop.permute.xlu0 %379 }
  0x85   :  { %v382_v25 = vmul.f32 %v380_v23, %v1225_v24 }
  0x87   :  { %v383_v26 = vsel %vm190_vm3, %v382_v25, 0.0 }
  0x88   :  { %v384_v27 = vrot.slane %v383_v26, 4 }
  0x8a   :  { %v385_v28 = vadd.f32 %v384_v27, %v383_v26 }
  0x8c   :  { %v386_v29 = vrot.slane %v385_v28, 2 }
  0x8e   :  { %v387_v30 = vadd.f32 %v386_v29, %v385_v28 }
  0x90   :  { %v388_v31 = vrot.slane %v387_v30, 1 }
  0x92   :  { %v389_v35 = vadd.f32 %v388_v31, %v387_v30 }
  0x94   :  { %v391_v36 = vmul.f32 %v389_v35, %v1232_v32  ;;  %v392_v37 = vmul.f32 %v389_v35, %v1237_v33  ;;  %v390_v38 = vmul.f32 %v389_v35, %v1242_v34  ;;  %v393_v43 = vmul.f32 %v389_v35, %v1250_v39 }
  0x96   :  { %v397_v40 = vsel %vm190_vm3, %v391_v36, 0.0  ;;  %v394_v41 = vsel %vm190_vm3, %v390_v38, 0.0  ;;  %v400_v42 = vsel %vm190_vm3, %v392_v37, 0.0  ;;  %v403_v44 = vsel %vm190_vm3, %v393_v43, 0.0 }
  0x97   :  { %398 = vadd.xlane.f32.xlu1 %v397_v40  ;;  %395 = vadd.xlane.f32.xlu0 %v394_v41  ;;  %v1151_v43 = vmov 1  }
  0x98   :  { %987 = vset.pattern.permute.xlu0 %v1151_v43 }
  0x9b   :  { %401 = vadd.xlane.f32.xlu1 %v400_v42 }
  0x9f   :  { %404 = vadd.xlane.f32.xlu1 %v403_v44 }
  0xb0   :  { %429 = vrot.lane.b32.xlu1 %v376_v10, %s1149_s18 }
  0xc5   :  { %v111_v13 = vpop.f32.mrf.mxu0  ;;  %v186_v17 = vpop.f32.mrf.mxu1 }
  0xc6   :  { %v112_v14 = vadd.f32 %v893_v12, %v111_v13 }
  0xc7   :  { %v948_v15 = vpop.f32.mrf.mxu0  ;;  %v953_v18 = vpop.f32.mrf.mxu1 }
  0xc8   :  { %994 = vtanh.f32 %v112_v14 }
  0xd5   :  { %v995_v16 = vpop.eup %994 }
  0xd6   :  { %963 = vmatmul.mubr.msk.f32.vlgmr.msra.gmra.mxu1 %vm190_vm3, %v995_v16 }
 0x120   :  { %v399_v54 = vpop.xlane.xlu1 %398  ;;  %v396_v57 = vpop.xlane.xlu0 %395 }
 0x124   :  { %v402_v61 = vpop.xlane.xlu1 %401 }
 0x128   :  { %v405_v0 = vpop.xlane.xlu1 %404 }
 0x12c   :  { %v430_v11 = vpop.permute.xlu1 %429 }
 0x196   :  { %v260_v46 = vpop.f32.mrf.mxu1 }
 0x197   :  { %v261_v47 = vadd.f32 %v260_v46, %v186_v17 }
 0x198   :  { %v964_v48 = vpop.f32.mrf.mxu1 }
 0x199   :  { %v268_v49 = vadd.f32 %v897_v45, %v261_v47 }
 0x19b   :  { %v269_v50 = vmax.f32 %v268_v49, 0.0 }
 0x19d   :  { %965 = vmatprep.subr.msk.mxu0 %vm190_vm3, %v269_v50 }
 0x19e   :  { %966 = vmatpush3.xpose.msk.msra.mxu0 %vm190_vm3, %v269_v50 }
 0x1a1   :  { %968 = vmatmul.mubr.msk.f32.vlgmr.msra.gmra.mxu0 %vm190_vm3, %v30_v51 }
 0x1a2   :  { %970 = vmatprep.mubr.msk.f32.mxu0 %vm190_vm3, %v31_v52 }
 0x1a5   :  { %971 = vmatmul.mubr.msk.f32.gmra.mxu0 %vm190_vm3, %v32_v53 }
 0x261   :  { %v1274_v55 = vpop.f32.mrf.mxu0 }
 0x262   :  { %v407_v56 = vadd.f32 %v1274_v55, %v399_v54 }
 0x263   :  { %v1277_v58 = vpop.f32.mrf.mxu0 }
 0x264   :  { %v406_v59 = vadd.f32 %v396_v57, %v1277_v58  ;;  %v904_v60 = vmul.f32 -1.442695, %v407_v56 }
 0x265   :  { %v1280_v63 = vpop.f32.mrf.mxu0 }
 0x266   :  { %v903_v62 = vmul.f32 -1.442695, %v406_v59  ;;  %996 = vpow2.f32 %v904_v60  ;;  %v409_v1 = vadd.f32 %v1280_v63, %v405_v0 }
 0x267   :  { %v1283_v2 = vpop.f32.mrf.mxu0 }
 0x268   :  { %998 = vpow2.f32 %v903_v62  ;;  %v905_v3 = vmul.f32 -1.442695, %v409_v1  ;;  %v408_v5 = vadd.f32 %v402_v61, %v1283_v2 }
 0x26a   :  { %1000 = vpow2.f32 %v905_v3 }
 0x273   :  { %v997_v4 = vpop.eup %996 }
 0x274   :  { %v420_v6 = vadd.f32 1.0, %v997_v4 }
 0x275   :  { %v999_v7 = vpop.eup %998 }
 0x276   :  { %v419_v8 = vadd.f32 1.0, %v999_v7  ;;  %1002 = vrcp.f32 %v420_v6 }
 0x277   :  { %1004 = vtanh.f32 %v408_v5  ;;  %v1001_v9 = vpop.eup %1000 }
 0x278   :  { %1006 = vrcp.f32 %v419_v8  ;;  %v421_v14 = vadd.f32 1.0, %v1001_v9 }
 0x27a   :  { %1008 = vrcp.f32 %v421_v14 }
 0x283   :  { %v1003_v10 = vpop.eup %1002 }
 0x284   :  { %v1005_v12 = vpop.eup %1004  ;;  %v432_v15 = vmul.f32 %v1003_v10, %v430_v11 }
 0x285   :  { %v1007_v13 = vpop.eup %1006 }
 0x286   :  { %v433_v16 = vmul.f32 %v1007_v13, %v1005_v12 }
 0x287   :  { %v1009_v18 = vpop.eup %1008 }
 0x288   :  { %v434_v17 = vadd.f32 %v433_v16, %v432_v15 }
 0x28a   :  { %1010 = vtanh.f32 %v434_v17 }
 0x297   :  { %v1011_v19 = vpop.eup %1010 }
 0x298   :  { %v1286_v20 = vmul.f32 %v1011_v19, %v1009_v18 }
 0x29a   :  { %439 = vperm.xlu1 %986, %v1286_v20  }
 0x315   :  { %v440_v21 = vpop.permute.xlu1 %439 }
 0x316   :  { %v442_v22 = vmul.f32 %v440_v21, %v1225_v24 }
 0x318   :  { %v443_v23 = vsel %vm190_vm3, %v442_v22, 0.0 }
 0x319   :  { %v444_v25 = vrot.slane %v443_v23, 4 }
 0x31b   :  { %v445_v26 = vadd.f32 %v444_v25, %v443_v23 }
 0x31d   :  { %v446_v27 = vrot.slane %v445_v26, 2 }
 0x31f   :  { %v447_v28 = vadd.f32 %v446_v27, %v445_v26 }
 0x321   :  { %v448_v29 = vrot.slane %v447_v28, 1 }
 0x323   :  { %v449_v30 = vadd.f32 %v448_v29, %v447_v28 }
 0x325   :  { %v451_v31 = vmul.f32 %v449_v30, %v1232_v32  ;;  %v450_v35 = vmul.f32 %v449_v30, %v1242_v34  ;;  %v452_v38 = vmul.f32 %v449_v30, %v1237_v33  ;;  %v453_v41 = vmul.f32 %v449_v30, %v1250_v39 }
 0x326   :  { %v1152_v30 = vmov 2  }
 0x327   :  { %v457_v36 = vsel %vm190_vm3, %v451_v31, 0.0  ;;  %v454_v37 = vsel %vm190_vm3, %v450_v35, 0.0  ;;  %v460_v40 = vsel %vm190_vm3, %v452_v38, 0.0  ;;  %v463_v42 = vsel %vm190_vm3, %v453_v41, 0.0  ;;  %988 = vset.pattern.permute.xlu1 %v1152_v30 }
 0x328   :  { %458 = vadd.xlane.f32.xlu0 %v457_v36  ;;  %455 = vadd.xlane.f32.xlu1 %v454_v37 }
 0x32c   :  { %461 = vadd.xlane.f32.xlu0 %v460_v40 }
 0x330   :  { %464 = vadd.xlane.f32.xlu0 %v463_v42 }
 0x346   :  { %490 = vrot.lane.b32.xlu0 %v434_v17, %s1150_s3 }
 0x3b1   :  { %v459_v44 = vpop.xlane.xlu0 %458  ;;  %v456_v45 = vpop.xlane.xlu1 %455 }
 0x3b2   :  { %v467_v46 = vadd.f32 %v1274_v55, %v459_v44  ;;  %v466_v47 = vadd.f32 %v456_v45, %v1277_v58 }
 0x3b4   :  { %v907_v48 = vmul.f32 -1.442695, %v467_v46  ;;  %v906_v49 = vmul.f32 -1.442695, %v466_v47 }
 0x3b5   :  { %v462_v50 = vpop.xlane.xlu0 %461 }
 0x3b6   :  { %1012 = vpow2.f32 %v907_v48  ;;  %v468_v54 = vadd.f32 %v462_v50, %v1283_v2 }
 0x3b7   :  { %1014 = vpow2.f32 %v906_v49 }
 0x3b9   :  { %v465_v51 = vpop.xlane.xlu0 %464 }
 0x3ba   :  { %v469_v52 = vadd.f32 %v1280_v63, %v465_v51 }
 0x3bc   :  { %v908_v53 = vmul.f32 -1.442695, %v469_v52 }
 0x3bd   :  { %v491_v1 = vpop.permute.xlu0 %490 }
 0x3be   :  { %1016 = vpow2.f32 %v908_v53 }
 0x3bf   :  { %1018 = vtanh.f32 %v468_v54 }
 0x3c3   :  { %v1013_v56 = vpop.eup %1012 }
 0x3c4   :  { %v1015_v57 = vpop.eup %1014  ;;  %v480_v59 = vadd.f32 1.0, %v1013_v56 }
 0x3c5   :  { %v479_v60 = vadd.f32 1.0, %v1015_v57 }
 0x3c6   :  { %1020 = vrcp.f32 %v480_v59 }
 0x3c7   :  { %1022 = vrcp.f32 %v479_v60 }
 0x3cb   :  { %v1017_v61 = vpop.eup %1016 }
 0x3cc   :  { %v1019_v62 = vpop.eup %1018  ;;  %v481_v4 = vadd.f32 1.0, %v1017_v61 }
 0x3ce   :  { %1024 = vrcp.f32 %v481_v4 }
 0x3d3   :  { %v1021_v0 = vpop.eup %1020 }
 0x3d4   :  { %v1023_v3 = vpop.eup %1022  ;;  %v493_v5 = vmul.f32 %v1021_v0, %v491_v1 }
 0x3d5   :  { %v494_v6 = vmul.f32 %v1023_v3, %v1019_v62 }
 0x3d7   :  { %v495_v7 = vadd.f32 %v494_v6, %v493_v5 }
 0x3d9   :  { %1026 = vtanh.f32 %v495_v7 }
 0x3db   :  { %v1025_v8 = vpop.eup %1024 }
 0x3e6   :  { %v1027_v9 = vpop.eup %1026 }
 0x3e7   :  { %v1304_v10 = vmul.f32 %v1027_v9, %v1025_v8 }
 0x3e9   :  { %500 = vperm.xlu0 %987, %v1304_v10   ;;  %v865_v1 = vsel %vm864_vm5, %v1286_v20, %v1304_v10 }
 0x464   :  { %v501_v11 = vpop.permute.xlu0 %500 }
 0x465   :  { %v503_v12 = vmul.f32 %v501_v11, %v1225_v24 }
 0x467   :  { %v504_v13 = vsel %vm190_vm3, %v503_v12, 0.0 }
 0x468   :  { %v505_v14 = vrot.slane %v504_v13, 4 }
 0x46a   :  { %v506_v15 = vadd.f32 %v505_v14, %v504_v13 }
 0x46c   :  { %v507_v16 = vrot.slane %v506_v15, 2 }
 0x46e   :  { %v508_v17 = vadd.f32 %v507_v16, %v506_v15 }
 0x470   :  { %v509_v18 = vrot.slane %v508_v17, 1 }
 0x472   :  { %v510_v19 = vadd.f32 %v509_v18, %v508_v17 }
 0x474   :  { %v513_v21 = vmul.f32 %v510_v19, %v1237_v33  ;;  %v511_v22 = vmul.f32 %v510_v19, %v1242_v34  ;;  %v512_v26 = vmul.f32 %v510_v19, %v1232_v32  ;;  %v514_v28 = vmul.f32 %v510_v19, %v1250_v39 }
 0x476   :  { %v521_v23 = vsel %vm190_vm3, %v513_v21, 0.0  ;;  %v515_v25 = vsel %vm190_vm3, %v511_v22, 0.0  ;;  %v518_v27 = vsel %vm190_vm3, %v512_v26, 0.0  ;;  %v524_v29 = vsel %vm190_vm3, %v514_v28, 0.0 }
 0x477   :  { %522 = vadd.xlane.f32.xlu0 %v521_v23  ;;  %516 = vadd.xlane.f32.xlu1 %v515_v25  ;;  %v1153_v21 = vmov 3  }
 0x47b   :  { %519 = vadd.xlane.f32.xlu1 %v518_v27 }
 0x47f   :  { %525 = vadd.xlane.f32.xlu1 %v524_v29 }
 0x490   :  { %551 = vrot.lane.b32.xlu1 %v495_v7, %s1150_s3 }
 0x500   :  { %v517_v31 = vpop.xlane.xlu1 %516  ;;  %v523_v43 = vpop.xlane.xlu0 %522 }
 0x501   :  { %v527_v35 = vadd.f32 %v517_v31, %v1277_v58  ;;  %v529_v47 = vadd.f32 %v523_v43, %v1283_v2 }
 0x503   :  { %v909_v36 = vmul.f32 -1.442695, %v527_v35 }
 0x504   :  { %v520_v37 = vpop.xlane.xlu1 %519 }
 0x505   :  { %1028 = vpow2.f32 %v909_v36  ;;  %v528_v38 = vadd.f32 %v1274_v55, %v520_v37 }
 0x507   :  { %v910_v40 = vmul.f32 -1.442695, %v528_v38 }
 0x508   :  { %v526_v41 = vpop.xlane.xlu1 %525 }
 0x509   :  { %1030 = vpow2.f32 %v910_v40  ;;  %v530_v42 = vadd.f32 %v1280_v63, %v526_v41 }
 0x50b   :  { %v911_v45 = vmul.f32 -1.442695, %v530_v42 }
 0x50c   :  { %v552_v56 = vpop.permute.xlu1 %551 }
 0x50d   :  { %1032 = vpow2.f32 %v911_v45 }
 0x512   :  { %v1029_v44 = vpop.eup %1028 }
 0x513   :  { %v540_v46 = vadd.f32 1.0, %v1029_v44 }
 0x515   :  { %1034 = vrcp.f32 %v540_v46 }
 0x516   :  { %v1031_v48 = vpop.eup %1030  ;;  %1036 = vtanh.f32 %v529_v47 }
 0x517   :  { %v541_v49 = vadd.f32 1.0, %v1031_v48 }
 0x519   :  { %1038 = vrcp.f32 %v541_v49 }
 0x51a   :  { %v1033_v50 = vpop.eup %1032 }
 0x51b   :  { %v542_v54 = vadd.f32 1.0, %v1033_v50 }
 0x51d   :  { %1040 = vrcp.f32 %v542_v54 }
 0x522   :  { %v1035_v51 = vpop.eup %1034 }
 0x523   :  { %v1037_v52 = vpop.eup %1036 }
 0x524   :  { %v555_v57 = vmul.f32 %v1037_v52, %v1035_v51 }
 0x526   :  { %v1039_v53 = vpop.eup %1038 }
 0x527   :  { %v554_v59 = vmul.f32 %v1039_v53, %v552_v56 }
 0x529   :  { %v556_v60 = vadd.f32 %v555_v57, %v554_v59 }
 0x52a   :  { %v1041_v61 = vpop.eup %1040 }
 0x52b   :  { %1042 = vtanh.f32 %v556_v60 }
 0x538   :  { %v1043_v62 = vpop.eup %1042 }
 0x539   :  { %v558_v0 = vmul.f32 %v1043_v62, %v1041_v61 }
 0x53b   :  { %561 = vperm.xlu1 %988, %v558_v0   ;;  %v1324_v3 = vsel %vm866_vm6, %v865_v1, %v558_v0 }
 0x53f   :  { %989 = vset.pattern.permute.xlu1 %v1153_v21 }
 0x5b6   :  { %v562_v4 = vpop.permute.xlu1 %561 }
 0x5b7   :  { %v564_v5 = vmul.f32 %v562_v4, %v1225_v24 }
 0x5b9   :  { %v565_v6 = vsel %vm190_vm3, %v564_v5, 0.0 }
 0x5ba   :  { %v566_v7 = vrot.slane %v565_v6, 4 }
 0x5bc   :  { %v567_v8 = vadd.f32 %v566_v7, %v565_v6 }
 0x5be   :  { %v568_v9 = vrot.slane %v567_v8, 2 }
 0x5c0   :  { %v569_v11 = vadd.f32 %v568_v9, %v567_v8 }
 0x5c2   :  { %v570_v12 = vrot.slane %v569_v11, 1 }
 0x5c4   :  { %v571_v13 = vadd.f32 %v570_v12, %v569_v11 }
 0x5c6   :  { %v573_v14 = vmul.f32 %v571_v13, %v1232_v32  ;;  %v572_v15 = vmul.f32 %v571_v13, %v1242_v34  ;;  %v574_v16 = vmul.f32 %v571_v13, %v1237_v33  ;;  %v575_v18 = vmul.f32 %v571_v13, %v1250_v39 }
 0x5c7   :  { %v1154_v13 = vmov 4  }
 0x5c8   :  { %v579_v20 = vsel %vm190_vm3, %v573_v14, 0.0  ;;  %v576_v10 = vsel %vm190_vm3, %v572_v15, 0.0  ;;  %v582_v17 = vsel %vm190_vm3, %v574_v16, 0.0  ;;  %v585_v19 = vsel %vm190_vm3, %v575_v18, 0.0 }
 0x5c9   :  { %580 = vadd.xlane.f32.xlu0 %v579_v20  ;;  %577 = vadd.xlane.f32.xlu1 %v576_v10 }
 0x5cd   :  { %583 = vadd.xlane.f32.xlu0 %v582_v17 }
 0x5d1   :  { %586 = vadd.xlane.f32.xlu0 %v585_v19 }
 0x5e7   :  { %612 = vrot.lane.b32.xlu0 %v556_v60, %s1150_s3 }
 0x652   :  { %v581_v22 = vpop.xlane.xlu0 %580  ;;  %v578_v23 = vpop.xlane.xlu1 %577 }
 0x653   :  { %v589_v25 = vadd.f32 %v1274_v55, %v581_v22  ;;  %v588_v26 = vadd.f32 %v578_v23, %v1277_v58 }
 0x655   :  { %v913_v27 = vmul.f32 -1.442695, %v589_v25  ;;  %v912_v28 = vmul.f32 -1.442695, %v588_v26 }
 0x656   :  { %v584_v29 = vpop.xlane.xlu0 %583 }
 0x657   :  { %1044 = vpow2.f32 %v913_v27  ;;  %v590_v36 = vadd.f32 %v584_v29, %v1283_v2 }
 0x658   :  { %1046 = vpow2.f32 %v912_v28 }
 0x65a   :  { %v587_v30 = vpop.xlane.xlu0 %586 }
 0x65b   :  { %v591_v31 = vadd.f32 %v1280_v63, %v587_v30 }
 0x65d   :  { %v914_v35 = vmul.f32 -1.442695, %v591_v31 }
 0x65e   :  { %v613_v45 = vpop.permute.xlu0 %612 }
 0x65f   :  { %1048 = vpow2.f32 %v914_v35 }
 0x660   :  { %1050 = vtanh.f32 %v590_v36 }
 0x664   :  { %v1045_v37 = vpop.eup %1044 }
 0x665   :  { %v1047_v38 = vpop.eup %1046  ;;  %v602_v40 = vadd.f32 1.0, %v1045_v37 }
 0x666   :  { %v601_v41 = vadd.f32 1.0, %v1047_v38 }
 0x667   :  { %1052 = vrcp.f32 %v602_v40 }
 0x668   :  { %1054 = vrcp.f32 %v601_v41 }
 0x66c   :  { %v1049_v42 = vpop.eup %1048 }
 0x66d   :  { %v1051_v43 = vpop.eup %1050  ;;  %v603_v47 = vadd.f32 1.0, %v1049_v42 }
 0x66f   :  { %1056 = vrcp.f32 %v603_v47 }
 0x674   :  { %v1053_v44 = vpop.eup %1052 }
 0x675   :  { %v1055_v46 = vpop.eup %1054  ;;  %v615_v48 = vmul.f32 %v1053_v44, %v613_v45 }
 0x676   :  { %v616_v49 = vmul.f32 %v1055_v46, %v1051_v43 }
 0x678   :  { %v617_v50 = vadd.f32 %v616_v49, %v615_v48 }
 0x67a   :  { %1058 = vtanh.f32 %v617_v50 }
 0x67c   :  { %v1057_v51 = vpop.eup %1056 }
 0x687   :  { %v1059_v52 = vpop.eup %1058 }
 0x688   :  { %v619_v53 = vmul.f32 %v1059_v52, %v1057_v51 }
 0x68a   :  { %622 = vperm.xlu1 %989, %v619_v53   ;;  %v1342_v54 = vsel %vm868_vm7, %v1324_v3, %v619_v53 }
 0x68e   :  { %990 = vset.pattern.permute.xlu1 %v1154_v13 }
 0x705   :  { %v623_v56 = vpop.permute.xlu1 %622 }
 0x706   :  { %v625_v57 = vmul.f32 %v623_v56, %v1225_v24 }
 0x708   :  { %v626_v59 = vsel %vm190_vm3, %v625_v57, 0.0 }
 0x709   :  { %v627_v60 = vrot.slane %v626_v59, 4 }
 0x70b   :  { %v628_v61 = vadd.f32 %v627_v60, %v626_v59 }
 0x70d   :  { %v629_v62 = vrot.slane %v628_v61, 2 }
 0x70f   :  { %v630_v0 = vadd.f32 %v629_v62, %v628_v61 }
 0x711   :  { %v631_v1 = vrot.slane %v630_v0, 1 }
 0x713   :  { %v632_v4 = vadd.f32 %v631_v1, %v630_v0 }
 0x715   :  { %v634_v5 = vmul.f32 %v632_v4, %v1232_v32  ;;  %v633_v6 = vmul.f32 %v632_v4, %v1242_v34  ;;  %v635_v8 = vmul.f32 %v632_v4, %v1237_v33  ;;  %v636_v11 = vmul.f32 %v632_v4, %v1250_v39 }
 0x716   :  { %v1155_v4 = vmov 5  }
 0x717   :  { %v640_v7 = vsel %vm190_vm3, %v634_v5, 0.0  ;;  %v637_v3 = vsel %vm190_vm3, %v633_v6, 0.0  ;;  %v643_v9 = vsel %vm190_vm3, %v635_v8, 0.0  ;;  %v646_v12 = vsel %vm190_vm3, %v636_v11, 0.0 }
 0x718   :  { %641 = vadd.xlane.f32.xlu1 %v640_v7  ;;  %638 = vadd.xlane.f32.xlu0 %v637_v3 }
 0x71c   :  { %644 = vadd.xlane.f32.xlu0 %v643_v9 }
 0x720   :  { %647 = vadd.xlane.f32.xlu0 %v646_v12 }
 0x736   :  { %673 = vrot.lane.b32.xlu0 %v617_v50, %s1150_s3 }
 0x7a1   :  { %v642_v14 = vpop.xlane.xlu1 %641  ;;  %v639_v15 = vpop.xlane.xlu0 %638 }
 0x7a2   :  { %v650_v20 = vadd.f32 %v1274_v55, %v642_v14  ;;  %v649_v10 = vadd.f32 %v639_v15, %v1277_v58 }
 0x7a4   :  { %v916_v16 = vmul.f32 -1.442695, %v650_v20  ;;  %v915_v17 = vmul.f32 -1.442695, %v649_v10 }
 0x7a5   :  { %v645_v18 = vpop.xlane.xlu0 %644 }
 0x7a6   :  { %1060 = vpow2.f32 %v916_v16  ;;  %v651_v23 = vadd.f32 %v645_v18, %v1283_v2 }
 0x7a7   :  { %1062 = vpow2.f32 %v915_v17 }
 0x7a9   :  { %v648_v19 = vpop.xlane.xlu0 %647 }
 0x7aa   :  { %v652_v21 = vadd.f32 %v1280_v63, %v648_v19 }
 0x7ac   :  { %v917_v22 = vmul.f32 -1.442695, %v652_v21 }
 0x7ad   :  { %v674_v35 = vpop.permute.xlu0 %673 }
 0x7ae   :  { %1064 = vpow2.f32 %v917_v22 }
 0x7af   :  { %1066 = vtanh.f32 %v651_v23 }
 0x7b3   :  { %v1061_v25 = vpop.eup %1060 }
 0x7b4   :  { %v1063_v26 = vpop.eup %1062  ;;  %v663_v27 = vadd.f32 1.0, %v1061_v25 }
 0x7b5   :  { %v662_v28 = vadd.f32 1.0, %v1063_v26 }
 0x7b6   :  { %1068 = vrcp.f32 %v663_v27 }
 0x7b7   :  { %1070 = vrcp.f32 %v662_v28 }
 0x7bb   :  { %v1065_v29 = vpop.eup %1064 }
 0x7bc   :  { %v1067_v30 = vpop.eup %1066  ;;  %v664_v37 = vadd.f32 1.0, %v1065_v29 }
 0x7be   :  { %1072 = vrcp.f32 %v664_v37 }
 0x7c3   :  { %v1069_v31 = vpop.eup %1068 }
 0x7c4   :  { %v1071_v36 = vpop.eup %1070  ;;  %v676_v38 = vmul.f32 %v1069_v31, %v674_v35 }
 0x7c5   :  { %v677_v40 = vmul.f32 %v1071_v36, %v1067_v30 }
 0x7c7   :  { %v678_v41 = vadd.f32 %v677_v40, %v676_v38 }
 0x7c9   :  { %1074 = vtanh.f32 %v678_v41 }
 0x7cb   :  { %v1073_v42 = vpop.eup %1072 }
 0x7d6   :  { %v1075_v43 = vpop.eup %1074 }
 0x7d7   :  { %v680_v44 = vmul.f32 %v1075_v43, %v1073_v42 }
 0x7d9   :  { %683 = vperm.xlu1 %990, %v680_v44   ;;  %v1360_v45 = vsel %vm870_vm8, %v1342_v54, %v680_v44 }
 0x7dd   :  { %991 = vset.pattern.permute.xlu1 %v1155_v4 }
 0x854   :  { %v684_v46 = vpop.permute.xlu1 %683 }
 0x855   :  { %v686_v47 = vmul.f32 %v684_v46, %v1225_v24 }
 0x857   :  { %v687_v48 = vsel %vm190_vm3, %v686_v47, 0.0 }
 0x858   :  { %v688_v49 = vrot.slane %v687_v48, 4 }
 0x85a   :  { %v689_v50 = vadd.f32 %v688_v49, %v687_v48 }
 0x85c   :  { %v690_v51 = vrot.slane %v689_v50, 2 }
 0x85e   :  { %v691_v52 = vadd.f32 %v690_v51, %v689_v50 }
 0x860   :  { %v692_v53 = vrot.slane %v691_v52, 1 }
 0x862   :  { %v693_v56 = vadd.f32 %v692_v53, %v691_v52 }
 0x864   :  { %v695_v57 = vmul.f32 %v693_v56, %v1232_v32  ;;  %v694_v59 = vmul.f32 %v693_v56, %v1242_v34  ;;  %v696_v61 = vmul.f32 %v693_v56, %v1237_v33  ;;  %v697_v0 = vmul.f32 %v693_v56, %v1250_v39 }
 0x865   :  { %v1156_v56 = vmov 6  }
 0x866   :  { %v701_v60 = vsel %vm190_vm3, %v695_v57, 0.0  ;;  %v698_v54 = vsel %vm190_vm3, %v694_v59, 0.0  ;;  %v704_v62 = vsel %vm190_vm3, %v696_v61, 0.0  ;;  %v707_v1 = vsel %vm190_vm3, %v697_v0, 0.0  ;;  %993 = vset.pattern.permute.xlu0 %v1156_v56 }
 0x867   :  { %702 = vadd.xlane.f32.xlu1 %v701_v60  ;;  %699 = vadd.xlane.f32.xlu0 %v698_v54 }
 0x86b   :  { %705 = vadd.xlane.f32.xlu0 %v704_v62 }
 0x86f   :  { %708 = vadd.xlane.f32.xlu0 %v707_v1 }
 0x885   :  { %734 = vrot.lane.b32.xlu0 %v678_v41, %s1150_s3 }
 0x8f0   :  { %v703_v5 = vpop.xlane.xlu1 %702  ;;  %v700_v6 = vpop.xlane.xlu0 %699 }
 0x8f1   :  { %v711_v7 = vadd.f32 %v1274_v55, %v703_v5  ;;  %v710_v3 = vadd.f32 %v700_v6, %v1277_v58 }
 0x8f3   :  { %v919_v8 = vmul.f32 -1.442695, %v711_v7  ;;  %v918_v9 = vmul.f32 -1.442695, %v710_v3 }
 0x8f4   :  { %v706_v11 = vpop.xlane.xlu0 %705 }
 0x8f5   :  { %1076 = vpow2.f32 %v919_v8  ;;  %v712_v15 = vadd.f32 %v706_v11, %v1283_v2 }
 0x8f6   :  { %1078 = vpow2.f32 %v918_v9 }
 0x8f8   :  { %v709_v12 = vpop.xlane.xlu0 %708 }
 0x8f9   :  { %v713_v13 = vadd.f32 %v1280_v63, %v709_v12 }
 0x8fb   :  { %v920_v14 = vmul.f32 -1.442695, %v713_v13 }
 0x8fc   :  { %v735_v22 = vpop.permute.xlu0 %734 }
 0x8fd   :  { %1080 = vpow2.f32 %v920_v14 }
 0x8fe   :  { %1082 = vtanh.f32 %v712_v15 }
 0x902   :  { %v1077_v20 = vpop.eup %1076 }
 0x903   :  { %v1079_v10 = vpop.eup %1078  ;;  %v724_v16 = vadd.f32 1.0, %v1077_v20 }
 0x904   :  { %v723_v17 = vadd.f32 1.0, %v1079_v10 }
 0x905   :  { %1084 = vrcp.f32 %v724_v16 }
 0x906   :  { %1086 = vrcp.f32 %v723_v17 }
 0x90a   :  { %v1081_v18 = vpop.eup %1080 }
 0x90b   :  { %v1083_v19 = vpop.eup %1082  ;;  %v725_v25 = vadd.f32 1.0, %v1081_v18 }
 0x90d   :  { %1088 = vrcp.f32 %v725_v25 }
 0x912   :  { %v1085_v21 = vpop.eup %1084 }
 0x913   :  { %v1087_v23 = vpop.eup %1086  ;;  %v737_v26 = vmul.f32 %v1085_v21, %v735_v22 }
 0x914   :  { %v738_v27 = vmul.f32 %v1087_v23, %v1083_v19 }
 0x916   :  { %v739_v28 = vadd.f32 %v738_v27, %v737_v26 }
 0x918   :  { %1090 = vtanh.f32 %v739_v28 }
 0x91a   :  { %v1089_v29 = vpop.eup %1088 }
 0x925   :  { %v1091_v30 = vpop.eup %1090 }
 0x926   :  { %v741_v31 = vmul.f32 %v1091_v30, %v1089_v29 }
 0x928   :  { %744 = vperm.xlu1 %991, %v741_v31   ;;  %v1378_v35 = vsel %vm872_vm9, %v1360_v45, %v741_v31 }
 0x92c   :  { %992 = vset.pattern.permute.xlu1 %v1156_v56 }
 0x9a3   :  { %v745_v36 = vpop.permute.xlu1 %744 }
 0x9a4   :  { %v747_v37 = vmul.f32 %v745_v36, %v1225_v24 }
 0x9a6   :  { %v748_v38 = vsel %vm190_vm3, %v747_v37, 0.0 }
 0x9a7   :  { %v749_v40 = vrot.slane %v748_v38, 4 }
 0x9a9   :  { %v750_v41 = vadd.f32 %v749_v40, %v748_v38 }
 0x9ab   :  { %v751_v42 = vrot.slane %v750_v41, 2 }
 0x9ad   :  { %v752_v43 = vadd.f32 %v751_v42, %v750_v41 }
 0x9af   :  { %v753_v44 = vrot.slane %v752_v43, 1 }
 0x9b1   :  { %v754_v46 = vadd.f32 %v753_v44, %v752_v43 }
 0x9b3   :  { %v756_v47 = vmul.f32 %v754_v46, %v1232_v32  ;;  %v755_v48 = vmul.f32 %v754_v46, %v1242_v34  ;;  %v757_v50 = vmul.f32 %v754_v46, %v1237_v33  ;;  %v758_v51 = vmul.f32 %v754_v46, %v1250_v39 }
 0x9b5   :  { %v762_v49 = vsel %vm190_vm3, %v756_v47, 0.0  ;;  %v759_v45 = vsel %vm190_vm3, %v755_v48, 0.0  ;;  %v765_v52 = vsel %vm190_vm3, %v757_v50, 0.0  ;;  %v768_v53 = vsel %vm190_vm3, %v758_v51, 0.0 }
 0x9b6   :  { %763 = vadd.xlane.f32.xlu0 %v762_v49  ;;  %760 = vadd.xlane.f32.xlu1 %v759_v45 }
 0x9ba   :  { %766 = vadd.xlane.f32.xlu0 %v765_v52  ;;  %769 = vadd.xlane.f32.xlu1 %v768_v53 }
 0x9d0   :  { %795 = vrot.lane.b32.xlu0 %v739_v28, %s1150_s3 }
 0xa3f   :  { %v764_v57 = vpop.xlane.xlu0 %763  ;;  %v761_v59 = vpop.xlane.xlu1 %760 }
 0xa40   :  { %v772_v60 = vadd.f32 %v1274_v55, %v764_v57  ;;  %v771_v54 = vadd.f32 %v761_v59, %v1277_v58 }
 0xa42   :  { %v922_v61 = vmul.f32 -1.442695, %v772_v60  ;;  %v921_v62 = vmul.f32 -1.442695, %v771_v54 }
 0xa43   :  { %v770_v0 = vpop.xlane.xlu1 %769  ;;  %v767_v4 = vpop.xlane.xlu0 %766 }
 0xa44   :  { %1092 = vpow2.f32 %v922_v61  ;;  %v774_v1 = vadd.f32 %v1280_v63, %v770_v0  ;;  %v773_v6 = vadd.f32 %v767_v4, %v1283_v2 }
 0xa45   :  { %1094 = vpow2.f32 %v921_v62 }
 0xa46   :  { %v923_v5 = vmul.f32 -1.442695, %v774_v1 }
 0xa47   :  { %v796_v14 = vpop.permute.xlu0 %795 }
 0xa48   :  { %1096 = vpow2.f32 %v923_v5 }
 0xa49   :  { %1098 = vtanh.f32 %v773_v6 }
 0xa51   :  { %v1093_v7 = vpop.eup %1092 }
 0xa52   :  { %v1095_v3 = vpop.eup %1094  ;;  %v785_v8 = vadd.f32 1.0, %v1093_v7 }
 0xa53   :  { %v784_v9 = vadd.f32 1.0, %v1095_v3 }
 0xa54   :  { %1100 = vrcp.f32 %v785_v8 }
 0xa55   :  { %1102 = vrcp.f32 %v784_v9  ;;  %v1097_v11 = vpop.eup %1096 }
 0xa56   :  { %v1099_v12 = vpop.eup %1098  ;;  %v786_v20 = vadd.f32 1.0, %v1097_v11 }
 0xa58   :  { %1104 = vrcp.f32 %v786_v20 }
 0xa61   :  { %v1101_v13 = vpop.eup %1100 }
 0xa62   :  { %v1103_v15 = vpop.eup %1102  ;;  %v798_v10 = vmul.f32 %v1101_v13, %v796_v14 }
 0xa63   :  { %v799_v16 = vmul.f32 %v1103_v15, %v1099_v12 }
 0xa65   :  { %v800_v17 = vadd.f32 %v799_v16, %v798_v10  ;;  %v1105_v18 = vpop.eup %1104 }
 0xa67   :  { %1106 = vtanh.f32 %v800_v17 }
 0xa74   :  { %v1107_v19 = vpop.eup %1106 }
 0xa75   :  { %v802_v21 = vmul.f32 %v1107_v19, %v1105_v18 }
 0xa77   :  { %805 = vperm.xlu1 %992, %v802_v21   ;;  %v1396_v22 = vsel %vm874_vm10, %v1378_v35, %v802_v21 }
 0xaf2   :  { %v806_v23 = vpop.permute.xlu1 %805 }
 0xaf3   :  { %v808_v25 = vmul.f32 %v806_v23, %v1225_v24 }
 0xaf5   :  { %v809_v26 = vsel %vm190_vm3, %v808_v25, 0.0 }
 0xaf6   :  { %v810_v27 = vrot.slane %v809_v26, 4 }
 0xaf8   :  { %v811_v28 = vadd.f32 %v810_v27, %v809_v26 }
 0xafa   :  { %v812_v29 = vrot.slane %v811_v28, 2 }
 0xafc   :  { %v813_v30 = vadd.f32 %v812_v29, %v811_v28 }
 0xafe   :  { %v814_v31 = vrot.slane %v813_v30, 1 }
 0xb00   :  { %v815_v36 = vadd.f32 %v814_v31, %v813_v30 }
 0xb02   :  { %v817_v37 = vmul.f32 %v815_v36, %v1232_v32  ;;  %v816_v38 = vmul.f32 %v815_v36, %v1242_v34  ;;  %v818_v41 = vmul.f32 %v815_v36, %v1237_v33  ;;  %v819_v24 = vmul.f32 %v815_v36, %v1250_v39 }
 0xb04   :  { %v823_v40 = vsel %vm190_vm3, %v817_v37, 0.0  ;;  %v820_v35 = vsel %vm190_vm3, %v816_v38, 0.0  ;;  %v826_v42 = vsel %vm190_vm3, %v818_v41, 0.0  ;;  %v829_v43 = vsel %vm190_vm3, %v819_v24, 0.0 }
 0xb05   :  { %824 = vadd.xlane.f32.xlu0 %v823_v40  ;;  %821 = vadd.xlane.f32.xlu1 %v820_v35 }
 0xb09   :  { %827 = vadd.xlane.f32.xlu0 %v826_v42  ;;  %830 = vadd.xlane.f32.xlu1 %v829_v43 }
 0xb1f   :  { %856 = vrot.lane.b32.xlu0 %v800_v17, %s1150_s3 }
 0xb8e   :  { %v825_v32 = vpop.xlane.xlu0 %824  ;;  %v822_v34 = vpop.xlane.xlu1 %821 }
 0xb8f   :  { %v833_v44 = vadd.f32 %v1274_v55, %v825_v32  ;;  %v832_v46 = vadd.f32 %v822_v34, %v1277_v58 }
 0xb91   :  { %v925_v47 = vmul.f32 -1.442695, %v833_v44  ;;  %v924_v33 = vmul.f32 -1.442695, %v832_v46 }
 0xb92   :  { %v831_v39 = vpop.xlane.xlu1 %830  ;;  %v828_v49 = vpop.xlane.xlu0 %827 }
 0xb93   :  { %1108 = vpow2.f32 %v925_v47  ;;  %v835_v48 = vadd.f32 %v1280_v63, %v831_v39  ;;  %v834_v50 = vadd.f32 %v828_v49, %v1283_v2 }
 0xb94   :  { %1110 = vpow2.f32 %v924_v33 }
 0xb95   :  { %v926_v45 = vmul.f32 -1.442695, %v835_v48 }
 0xb96   :  { %v857_v59 = vpop.permute.xlu0 %856 }
 0xb97   :  { %1112 = vpow2.f32 %v926_v45 }
 0xb98   :  { %1114 = vtanh.f32 %v834_v50 }
 0xba0   :  { %v1109_v51 = vpop.eup %1108 }
 0xba1   :  { %v1111_v52 = vpop.eup %1110  ;;  %v846_v53 = vadd.f32 1.0, %v1109_v51 }
 0xba2   :  { %v845_v56 = vadd.f32 1.0, %v1111_v52 }
 0xba3   :  { %1116 = vrcp.f32 %v846_v53 }
 0xba4   :  { %1118 = vrcp.f32 %v845_v56  ;;  %v1113_v55 = vpop.eup %1112 }
 0xba5   :  { %v1115_v58 = vpop.eup %1114  ;;  %v847_v54 = vadd.f32 1.0, %v1113_v55 }
 0xba7   :  { %1120 = vrcp.f32 %v847_v54 }
 0xbb0   :  { %v1117_v57 = vpop.eup %1116 }
 0xbb1   :  { %v1119_v60 = vpop.eup %1118  ;;  %v859_v61 = vmul.f32 %v1117_v57, %v857_v59 }
 0xbb2   :  { %v860_v63 = vmul.f32 %v1119_v60, %v1115_v58 }
 0xbb4   :  { %v861_v62 = vadd.f32 %v860_v63, %v859_v61  ;;  %v1121_v2 = vpop.eup %1120 }
 0xbb6   :  { %1122 = vtanh.f32 %v861_v62 }
 0xbc3   :  { %v1123_v0 = vpop.eup %1122 }
 0xbc4   :  { %v863_v1 = vmul.f32 %v1123_v0, %v1121_v2 }
 0xbc6   :  { %v877_v4 = vsel %vm876_vm11, %v1396_v22, %v863_v1 }
 0xbc7   :  { %878 = vst.msk [vmem:[#allocation2] sm:$0xff] %vm116_vm2, %v877_v4 }
 0xbc8   :  { %1135 = shalt.err (!%p1132_p4)
}
 0xbc9   :  { %888 = dma.vmem_to_hbm [thread:$0]  %s886_s27, 128, %s1422_s4, [#allocation3]  }
 0xbca   :  { %1144 = dma.done.wait [#allocation3], 128  }
 0xbcb   :  { %1145 = vsyncadd [#allocation3], 4294967168 }
 0xbcc   :  { %892 = vsyncpa [#allocation3], 1 }

</bundles_post_ra>
